<compile_context>
chip_gen: v5e
topology: v5e:2x2
jax: 0.10.0
libtpu: 0.0.40
codegen_flags: <defaults>
</compile_context>

<pallas_src>
import functools

import jax
import jax.numpy as jnp
from jax.experimental import pallas as pl
from jax.experimental.pallas import tpu as pltpu

_LANE = 128
_SUBLANE = 8
_ALIGN = _SUBLANE * _LANE               # 1024 elements
_TARGET_BLOCK_BYTES = 2 * 1024 * 1024   # ~2 MiB per input block (see header)


def _dice_partials_kernel(x_ref, t_ref, o_ref, *, valid_last_rows):
    """Accumulate lane-wise partial sums of (x*t, x, t) into o_ref.

    o_ref has shape (3, 8, 128) f32 and stays resident in VMEM across the
    whole (reduction) grid axis; o_ref[0] holds intersection partials,
    o_ref[1] sum(Inputs) partials, o_ref[2] sum(Targets) partials.
    """
    s = pl.program_id(0)
    last = pl.num_programs(0) - 1

    @pl.when(s == 0)
    def _():
        o_ref[...] = jnp.zeros_like(o_ref)

    def accumulate(x, t):
        x = x.astype(jnp.float32)
        t = t.astype(jnp.float32)
        # Layout-compatible reshape -> pure VPU adds down to one (8,128) vreg
        # per quantity; no cross-lane work inside the kernel.
        xr = x.reshape(-1, _SUBLANE, _LANE)
        tr = t.reshape(-1, _SUBLANE, _LANE)
        o_ref[0] += jnp.sum(xr * tr, axis=0)   # intersection partials
        o_ref[1] += jnp.sum(xr, axis=0)        # sum(Inputs) partials
        o_ref[2] += jnp.sum(tr, axis=0)        # sum(Targets) partials

    tile_rows = x_ref.shape[0]
    if valid_last_rows == tile_rows:
        # Every block is full: single unconditional accumulate path.
        accumulate(x_ref[...], t_ref[...])
    else:
        # Only the final block overhangs the real row count.  Gate at runtime
        # so full blocks pay zero extra work; the overhanging block reads only
        # its statically-sized valid prefix (a multiple of 8 rows), so no
        # masking ops are needed at all.
        @pl.when(s != last)
        def _():
            accumulate(x_ref[...], t_ref[...])

        @pl.when(s == last)
        def _():
            accumulate(x_ref[:valid_last_rows, :], t_ref[:valid_last_rows, :])


@functools.partial(jax.jit, static_argnames=("smooth",))
def dice_loss(inputs, targets, smooth=1.0):
    """Pallas TPU implementation of DiceLoss.forward. Returns a scalar f32."""
    assert inputs.shape == targets.shape

    x = inputs.reshape(-1)     # native dtype; cast happens in-kernel
    t = targets.reshape(-1)
    n = x.shape[0]

    # Kernel consumes only the 1024-aligned prefix; the tiny ragged tail is
    # summed in the wrapper (fused by XLA).  No jnp.pad full-copy.
    n_main = (n // _ALIGN) * _ALIGN

    sum_xt = jnp.float32(0.0)
    sum_x = jnp.float32(0.0)
    sum_t = jnp.float32(0.0)

    if n_main > 0:
        rows = n_main // _LANE                      # multiple of 8
        itemsize = jnp.dtype(x.dtype).itemsize
        target_rows = _TARGET_BLOCK_BYTES // (_LANE * itemsize)
        target_rows = max(_SUBLANE, (target_rows // _SUBLANE) * _SUBLANE)
        tile_rows = min(target_rows, rows)          # multiple of 8
        steps = (rows + tile_rows - 1) // tile_rows
        valid_last_rows = rows - (steps - 1) * tile_rows   # static, >0, %8==0

        if n_main == n:
            xm, tm = x, t                            # no slice, no copy
        else:
            xm, tm = x[:n_main], t[:n_main]
        x2 = xm.reshape(rows, _LANE)
        t2 = tm.reshape(rows, _LANE)

        kernel = functools.partial(
            _dice_partials_kernel, valid_last_rows=valid_last_rows)

        partials = pl.pallas_call(
            kernel,
            out_shape=jax.ShapeDtypeStruct((3, _SUBLANE, _LANE), jnp.float32),
            grid_spec=pltpu.PrefetchScalarGridSpec(
                num_scalar_prefetch=0,
                grid=(steps,),
                in_specs=[
                    pl.BlockSpec((tile_rows, _LANE), lambda s: (s, 0)),
                    pl.BlockSpec((tile_rows, _LANE), lambda s: (s, 0)),
                ],
                out_specs=pl.BlockSpec(
                    (3, _SUBLANE, _LANE), lambda s: (0, 0, 0)),
            ),
            compiler_params=pltpu.CompilerParams(
                dimension_semantics=("arbitrary",)),
        )(x2, t2)

        # Single cross-lane reduction on the tiny partials tensor.
        sums = jnp.sum(partials, axis=(1, 2))        # (3,)
        sum_xt = sum_xt + sums[0]
        sum_x = sum_x + sums[1]
        sum_t = sum_t + sums[2]

    if n_main < n:
        # <=1023-element ragged tail: trivially fused elementwise + reduce.
        x_tail = x[n_main:].astype(jnp.float32)
        t_tail = t[n_main:].astype(jnp.float32)
        sum_xt = sum_xt + jnp.sum(x_tail * t_tail)
        sum_x = sum_x + jnp.sum(x_tail)
        sum_t = sum_t + jnp.sum(t_tail)

    dice_coefficient = (2.0 * sum_xt + smooth) / (sum_x + sum_t + smooth)
    return 1.0 - dice_coefficient


def _dice_loss_ref(inputs, targets, smooth=1.0):
    x = inputs.astype(jnp.float32)
    t = targets.astype(jnp.float32)
    intersection = jnp.sum(x * t)
    dice_coefficient = (2.0 * intersection + smooth) / (
        jnp.sum(x) + jnp.sum(t) + smooth)
    return 1.0 - dice_coefficient


if __name__ == "__main__":
    key = jax.random.PRNGKey(0)
    k1, k2, k3, k4 = jax.random.split(key, 4)

    # 1) Primary small example consistent with a segmentation head (NCHW),
    #    N % 1024 == 0 -> single full block, unconditional path.
    inputs = jax.nn.sigmoid(jax.random.normal(k1, (2, 4, 16, 16), jnp.float32))
    targets = (jax.random.uniform(k2, (2, 4, 16, 16)) > 0.5).astype(jnp.float32)
    loss = dice_loss(inputs, targets, smooth=1.0)
    jax.block_until_ready(loss)
    ref = _dice_loss_ref(inputs, targets, smooth=1.0)
    assert jnp.allclose(loss, ref, rtol=1e-5, atol=1e-6), (loss, ref)

    # 2) Ragged size: exercises the wrapper-side tail sums (no pad, no mask).
    inputs2 = jax.nn.sigmoid(jax.random.normal(k3, (2, 3, 21, 17), jnp.float32))
    targets2 = (jax.random.uniform(k4, (2, 3, 21, 17)) > 0.5).astype(jnp.float32)
    loss2 = dice_loss(inputs2, targets2, smooth=1.0)
    ref2 = _dice_loss_ref(inputs2, targets2, smooth=1.0)
    assert jnp.allclose(loss2, ref2, rtol=1e-5, atol=1e-6), (loss2, ref2)

    # 3) Multi-step grid with an overhanging (statically sliced) last block.
    inputs3 = jax.nn.sigmoid(
        jax.random.normal(k1, (3, 4, 256, 256), jnp.float32))
    targets3 = (jax.random.uniform(k2, (3, 4, 256, 256)) > 0.5).astype(
        jnp.float32)
    loss3 = dice_loss(inputs3, targets3, smooth=1.0)
    ref3 = _dice_loss_ref(inputs3, targets3, smooth=1.0)
    assert jnp.allclose(loss3, ref3, rtol=1e-5, atol=1e-5), (loss3, ref3)

    # 4) Native bf16 inputs (streamed in bf16, cast in-kernel).
    inputs4 = jax.nn.sigmoid(
        jax.random.normal(k3, (8, 4, 128, 128), jnp.bfloat16))
    targets4 = (jax.random.uniform(k4, (8, 4, 128, 128)) > 0.5).astype(
        jnp.bfloat16)
    loss4 = dice_loss(inputs4, targets4, smooth=1.0)
    ref4 = _dice_loss_ref(inputs4, targets4, smooth=1.0)
    assert jnp.allclose(loss4, ref4, rtol=1e-3, atol=1e-3), (loss4, ref4)

    jax.block_until_ready((loss, loss2, loss3, loss4))
    print("KERNEL_OK")
</pallas_src>

<mosaic_0001>
module attributes {stable_mosaic.version = 11 : i64} {
  func.func @_dice_partials_kernel(%arg0: i32, %arg1: memref<16x128xf32, #tpu.memory_space<vmem>>, %arg2: memref<16x128xf32, #tpu.memory_space<vmem>>, %arg3: memref<3x8x128xf32, #tpu.memory_space<vmem>>) attributes {dimension_semantics = [#tpu.dimension_semantics<arbitrary>], iteration_bounds = array<i64: 1>, scalar_prefetch = 0 : i64, scratch_operands = 0 : i64, tpu.core_type = #tpu.core_type<tc>, window_params = [{transform_indices = @transform_0, window_bounds = array<i64: 16, 128>}, {transform_indices = @transform_1, window_bounds = array<i64: 16, 128>}, {pipeline_mode = #tpu.pipeline_mode<synchronous>, transform_indices = @transform_2, window_bounds = array<i64: 3, 8, 128>}]} {
    %c0_i32 = arith.constant 0 : i32
    %0 = arith.cmpi eq, %arg0, %c0_i32 : i32
    %1 = arith.extui %0 : i1 to i32
    %c0_i32_0 = arith.constant 0 : i32
    %2 = arith.cmpi ne, %1, %c0_i32_0 : i32
    scf.if %2 {
      %cst_22 = arith.constant 0.000000e+00 : f32
      %29 = vector.broadcast %cst_22 : f32 to vector<3x8x128xf32>
      %c0_23 = arith.constant 0 : index
      %c0_24 = arith.constant 0 : index
      %c0_25 = arith.constant 0 : index
      %30 = vector.load %arg3[%c0_23, %c0_24, %c0_25] : memref<3x8x128xf32, #tpu.memory_space<vmem>>, vector<3x8x128xf32>
      tpu.vector_store %arg3[%c0_23, %c0_24, %c0_25], %29 {strides = array<i32>} : memref<3x8x128xf32, #tpu.memory_space<vmem>>, vector<3x8x128xf32>,
    } else {
    }
    %c0 = arith.constant 0 : index
    %c0_1 = arith.constant 0 : index
    %3 = vector.load %arg1[%c0, %c0_1] : memref<16x128xf32, #tpu.memory_space<vmem>>, vector<16x128xf32>
    %c0_2 = arith.constant 0 : index
    %c0_3 = arith.constant 0 : index
    %4 = vector.load %arg2[%c0_2, %c0_3] : memref<16x128xf32, #tpu.memory_space<vmem>>, vector<16x128xf32>
    %5 = vector.shape_cast %3 : vector<16x128xf32> to vector<2x8x128xf32>
    %6 = vector.shape_cast %4 : vector<16x128xf32> to vector<2x8x128xf32>
    %c0_4 = arith.constant 0 : index
    %c0_5 = arith.constant 0 : index
    %c0_6 = arith.constant 0 : index
    %7 = vector.load %arg3[%c0_4, %c0_5, %c0_6] : memref<3x8x128xf32, #tpu.memory_space<vmem>>, vector<1x8x128xf32>
    %8 = vector.shape_cast %7 : vector<1x8x128xf32> to vector<8x128xf32>
    %9 = arith.mulf %5, %6 : vector<2x8x128xf32>
    %cst = arith.constant dense<0.000000e+00> : vector<8x128xf32>
    %10 = vector.multi_reduction <add>, %9, %cst [0] : vector<2x8x128xf32> to vector<8x128xf32>
    %11 = arith.addf %8, %10 : vector<8x128xf32>
    %c0_7 = arith.constant 0 : index
    %c0_8 = arith.constant 0 : index
    %c0_9 = arith.constant 0 : index
    %12 = vector.load %arg3[%c0_7, %c0_8, %c0_9] : memref<3x8x128xf32, #tpu.memory_space<vmem>>, vector<1x8x128xf32>
    %13 = vector.shape_cast %12 : vector<1x8x128xf32> to vector<8x128xf32>
    %14 = vector.shape_cast %11 : vector<8x128xf32> to vector<1x8x128xf32>
    tpu.vector_store %arg3[%c0_7, %c0_8, %c0_9], %14 {strides = array<i32>} : memref<3x8x128xf32, #tpu.memory_space<vmem>>, vector<1x8x128xf32>,
    %c1 = arith.constant 1 : index
    %c0_10 = arith.constant 0 : index
    %c0_11 = arith.constant 0 : index
    %15 = vector.load %arg3[%c1, %c0_10, %c0_11] : memref<3x8x128xf32, #tpu.memory_space<vmem>>, vector<1x8x128xf32>
    %16 = vector.shape_cast %15 : vector<1x8x128xf32> to vector<8x128xf32>
    %cst_12 = arith.constant dense<0.000000e+00> : vector<8x128xf32>
    %17 = vector.multi_reduction <add>, %5, %cst_12 [0] : vector<2x8x128xf32> to vector<8x128xf32>
    %18 = arith.addf %16, %17 : vector<8x128xf32>
    %c1_13 = arith.constant 1 : index
    %c0_14 = arith.constant 0 : index
    %c0_15 = arith.constant 0 : index
    %19 = vector.load %arg3[%c1_13, %c0_14, %c0_15] : memref<3x8x128xf32, #tpu.memory_space<vmem>>, vector<1x8x128xf32>
    %20 = vector.shape_cast %19 : vector<1x8x128xf32> to vector<8x128xf32>
    %21 = vector.shape_cast %18 : vector<8x128xf32> to vector<1x8x128xf32>
    tpu.vector_store %arg3[%c1_13, %c0_14, %c0_15], %21 {strides = array<i32>} : memref<3x8x128xf32, #tpu.memory_space<vmem>>, vector<1x8x128xf32>,
    %c2 = arith.constant 2 : index
    %c0_16 = arith.constant 0 : index
    %c0_17 = arith.constant 0 : index
    %22 = vector.load %arg3[%c2, %c0_16, %c0_17] : memref<3x8x128xf32, #tpu.memory_space<vmem>>, vector<1x8x128xf32>
    %23 = vector.shape_cast %22 : vector<1x8x128xf32> to vector<8x128xf32>
    %cst_18 = arith.constant dense<0.000000e+00> : vector<8x128xf32>
    %24 = vector.multi_reduction <add>, %6, %cst_18 [0] : vector<2x8x128xf32> to vector<8x128xf32>
    %25 = arith.addf %23, %24 : vector<8x128xf32>
    %c2_19 = arith.constant 2 : index
    %c0_20 = arith.constant 0 : index
    %c0_21 = arith.constant 0 : index
    %26 = vector.load %arg3[%c2_19, %c0_20, %c0_21] : memref<3x8x128xf32, #tpu.memory_space<vmem>>, vector<1x8x128xf32>
    %27 = vector.shape_cast %26 : vector<1x8x128xf32> to vector<8x128xf32>
    %28 = vector.shape_cast %25 : vector<8x128xf32> to vector<1x8x128xf32>
    tpu.vector_store %arg3[%c2_19, %c0_20, %c0_21], %28 {strides = array<i32>} : memref<3x8x128xf32, #tpu.memory_space<vmem>>, vector<1x8x128xf32>,
    return
  }
  func.func @transform_0(%arg0: i32) -> (i32, i32) {
    %c0_i32 = arith.constant 0 : i32
    %c0_i32_0 = arith.constant 0 : i32
    return %arg0, %c0_i32 : i32, i32
  }
  func.func @transform_1(%arg0: i32) -> (i32, i32) {
    %c0_i32 = arith.constant 0 : i32
    %c0_i32_0 = arith.constant 0 : i32
    return %arg0, %c0_i32 : i32, i32
  }
  func.func @transform_2(%arg0: i32) -> (i32, i32, i32) {
    %c0_i32 = arith.constant 0 : i32
    %c0_i32_0 = arith.constant 0 : i32
    %c0_i32_1 = arith.constant 0 : i32
    %c0_i32_2 = arith.constant 0 : i32
    return %c0_i32, %c0_i32_0, %c0_i32_1 : i32, i32, i32
  }
}

</mosaic_0001>

<bundles_post_ra>
// kernel: dice_loss.1
= control target key start
LH: loop header
LB: loop body
LE: loop exit
PB: predicated region body
PF: predicated region fallthrough
CT: control target
= control target key end

     0   :  { %s83_s0 = inlined_call_operand.vmem [shape: f32[16,128], index: 0, kind: input, shape index: {}]   ;;  %s84_s1 = inlined_call_operand.vmem [shape: f32[16,128], index: 1, kind: input, shape index: {}]   ;;  %s85_s2 = inlined_call_operand.vmem [shape: f32[3,8,128], index: 2, kind: output, shape index: {}]  }
   0x1   :  { %v18_v0 = vld [vmem:[%s83_s0] sm:$0xff]  ;;  %v19_v1 = vld [vmem:[%s83_s0 + $0x8] sm:$0xff] }
   0x2   :  { %v20_v2 = vld [vmem:[%s84_s1] sm:$0xff]  ;;  %v21_v3 = vld [vmem:[%s84_s1 + $0x8] sm:$0xff]  ;;  %v30_v5 = vadd.f32 %v19_v1, %v18_v0 }
   0x3   :  { %v23_v4 = vmul.f32 %v20_v2, %v18_v0  ;;  %v24_v6 = vmul.f32 %v21_v3, %v19_v1  ;;  %v35_v7 = vadd.f32 %v21_v3, %v20_v2 }
   0x4   :  { %43 = vst [vmem:[%s85_s2 + $0x8] sm:$0xff] %v30_v5 }
   0x5   :  { %v25_v8 = vadd.f32 %v24_v6, %v23_v4  ;;  %45 = vst [vmem:[%s85_s2 + $0x10] sm:$0xff] %v35_v7 }
   0x7   :  { %27 = vst [vmem:[%s85_s2] sm:$0xff] %v25_v8 }

</bundles_post_ra>
